<compile_context>
chip_gen: v7x
topology: tpu7x:2x2x1
jax: 0.10.0
libtpu: 0.0.40
codegen_flags: <defaults>
</compile_context>

<pallas_src>
import functools

import jax
import jax.numpy as jnp
from jax.experimental import pallas as pl
from jax.experimental.pallas import tpu as pltpu


# ----------------------------------------------------------------------------
# Fused Pallas kernel
# ----------------------------------------------------------------------------
def _enc_combiner_kernel(x1_ref, x2_ref,
                         w_f3x_ref, b_f3x_ref,
                         w_f3y_ref, b_f3y_ref,
                         w_s2xy_ref, b_s2xy_ref,
                         o_ref, *, T, NL):
    """Fused 1x1 convs (channels-first) + channel-chunk + Bayesian aggregation.

    x1_ref : (1, T, Cin1, TL)    x2_ref : (1, Cin2, TL)
    w_*    : (Cout, Cin)         b_*    : (Cout, 1)          Cout = 2*NL
    o_ref  : (1, n_out, Cout, TL), n_out = 2 if T > 1 else 1.
             slot 0 = ftr_x aggregation (if T > 1), last slot = ftr_y branch.
    """
    x1 = x1_ref[0]          # (T, Cin1, TL)  -- single full-block load
    x2 = x2_ref[0]          # (Cin2, TL)

    def conv(w_ref, b_ref, x):
        # 1x1 conv == channel matmul; output (Cout, TL) is lane-dense.
        return (jnp.dot(w_ref[...], x, preferred_element_type=jnp.float32)
                + b_ref[...])

    def bayag_step(m, s, mu_i, sig_i):
        # q = s / (s + sig_i); divide on EUP via approx reciprocal.
        q = s * pl.reciprocal(s + sig_i, approx=True)
        m = m + q * (mu_i - m)
        s = (1.0 - q) * s
        return m, s

    # ---- y branch: BayAg over {conv_f3y(x1[:, -1]), conv_s2xy(x2)} ----
    fy = conv(w_f3y_ref, b_f3y_ref, x1[T - 1])          # (2NL, TL)
    x2c = conv(w_s2xy_ref, b_s2xy_ref, x2)              # (2NL, TL)
    m_y = fy[:NL, :]
    s_y = jnp.exp(fy[NL:, :])
    m_y, s_y = bayag_step(m_y, s_y, x2c[:NL, :], jnp.exp(x2c[NL:, :]))
    y_slot = 1 if T > 1 else 0
    o_ref[0, y_slot, :, :] = jnp.concatenate([m_y, jnp.log(s_y)], axis=0)

    # ---- x branch: TimeDist(conv_f3x) over x1[:, :-1], BayAg over T-1 steps ----
    if T > 1:
        fx0 = conv(w_f3x_ref, b_f3x_ref, x1[0])
        if T - 1 == 1:
            # bayesian_aggregation over a single element returns it unchanged.
            o_ref[0, 0, :, :] = fx0
        else:
            m_x = fx0[:NL, :]
            s_x = jnp.exp(fx0[NL:, :])
            for i in range(1, T - 1):                    # static, small -> unrolled
                fxi = conv(w_f3x_ref, b_f3x_ref, x1[i])
                m_x, s_x = bayag_step(m_x, s_x, fxi[:NL, :], jnp.exp(fxi[NL:, :]))
            o_ref[0, 0, :, :] = jnp.concatenate([m_x, jnp.log(s_x)], axis=0)


# ----------------------------------------------------------------------------
# Wrapper
# ----------------------------------------------------------------------------
def _pick_lane_tile(hw, cap=2048):
    """Largest multiple of 128 that divides hw (capped); full width otherwise."""
    if hw % 128 != 0:
        return hw
    tl = min(hw, cap)
    tl = (tl // 128) * 128
    while hw % tl != 0:
        tl -= 128
    return tl


def enc_combiner_forward(x1, x2, params):
    """EncCombinerCell.forward for encComb='agg', convFBefAg=True, agg='BayAg'.

    x1: [B, T, Cin1, H, W], x2: [B, Cin2, H, W]
    returns: [B, 2, 2*NL, H, W]  (or [B, 1, 2*NL, H, W] if T == 1)
    """
    B, T, Cin1, H, W = x1.shape
    Cin2 = x2.shape[1]
    Cout = params["w_f3y"].shape[0]
    NL = Cout // 2
    HW = H * W
    n_out = 2 if T > 1 else 1

    TL = _pick_lane_tile(HW)
    n_l = HW // TL

    # Channels-first end-to-end: pure reshapes only, no transpose/copy.
    x1f = x1.reshape(B, T, Cin1, HW)
    x2f = x2.reshape(B, Cin2, HW)
    b_f3x = params["b_f3x"].reshape(Cout, 1)
    b_f3y = params["b_f3y"].reshape(Cout, 1)
    b_s2xy = params["b_s2xy"].reshape(Cout, 1)

    out = pl.pallas_call(
        functools.partial(_enc_combiner_kernel, T=T, NL=NL),
        out_shape=jax.ShapeDtypeStruct((B, n_out, Cout, HW), jnp.float32),
        grid=(B, n_l),
        in_specs=[
            pl.BlockSpec((1, T, Cin1, TL), lambda b, l: (b, 0, 0, l)),
            pl.BlockSpec((1, Cin2, TL), lambda b, l: (b, 0, l)),
            pl.BlockSpec((Cout, Cin1), lambda b, l: (0, 0)),
            pl.BlockSpec((Cout, 1), lambda b, l: (0, 0)),
            pl.BlockSpec((Cout, Cin1), lambda b, l: (0, 0)),
            pl.BlockSpec((Cout, 1), lambda b, l: (0, 0)),
            pl.BlockSpec((Cout, Cin2), lambda b, l: (0, 0)),
            pl.BlockSpec((Cout, 1), lambda b, l: (0, 0)),
        ],
        out_specs=pl.BlockSpec((1, n_out, Cout, TL), lambda b, l: (b, 0, 0, l)),
        compiler_params=pltpu.CompilerParams(
            dimension_semantics=("parallel", "parallel")),
    )(x1f, x2f, params["w_f3x"], b_f3x, params["w_f3y"], b_f3y,
      params["w_s2xy"], b_s2xy)

    return out.reshape(B, n_out, Cout, H, W)


def init_params(key, Cin1, Cin2, num_latent_per_group):
    Cout = 2 * num_latent_per_group
    ks = jax.random.split(key, 6)
    scale = 0.1
    return {
        "w_f3x": scale * jax.random.normal(ks[0], (Cout, Cin1), jnp.float32),
        "b_f3x": scale * jax.random.normal(ks[1], (Cout,), jnp.float32),
        "w_f3y": scale * jax.random.normal(ks[2], (Cout, Cin1), jnp.float32),
        "b_f3y": scale * jax.random.normal(ks[3], (Cout,), jnp.float32),
        "w_s2xy": scale * jax.random.normal(ks[4], (Cout, Cin2), jnp.float32),
        "b_s2xy": scale * jax.random.normal(ks[5], (Cout,), jnp.float32),
    }


# ----------------------------------------------------------------------------
# Pure-JAX reference (mirrors the PyTorch module) for a correctness check
# ----------------------------------------------------------------------------
def _reference_forward(x1, x2, params):
    def conv(x, w, b):  # x: [N, Cin, H, W]
        return jnp.einsum("oc,nchw->nohw", w, x) + b[None, :, None, None]

    def bayag(mu, ls):  # [B, T', NL, H, W] -> [B, NL, H, W]
        if mu.shape[1] == 1:
            return mu[:, 0], ls[:, 0]
        sig = jnp.exp(ls)
        m, s = mu[:, 0], sig[:, 0]
        for i in range(1, mu.shape[1]):
            q = s / (s + sig[:, i])
            m = m + q * (mu[:, i] - m)
            s = (1.0 - q) * s
        return m, jnp.log(s)

    B, T, Cin1, H, W = x1.shape
    NL = params["w_f3y"].shape[0] // 2
    x2c = conv(x2, params["w_s2xy"], params["b_s2xy"])
    ftr_y = conv(x1[:, -1], params["w_f3y"], params["b_f3y"])
    fy2 = jnp.stack([ftr_y, x2c], axis=1)
    mu_y, ls_y = bayag(fy2[:, :, :NL], fy2[:, :, NL:])
    out_y = jnp.concatenate([mu_y, ls_y], axis=1)[:, None]
    if T > 1:
        fx = conv(x1[:, :-1].reshape(B * (T - 1), Cin1, H, W),
                  params["w_f3x"], params["b_f3x"]).reshape(B, T - 1, -1, H, W)
        mu_x, ls_x = bayag(fx[:, :, :NL], fx[:, :, NL:])
        out_x = jnp.concatenate([mu_x, ls_x], axis=1)[:, None]
        return jnp.concatenate([out_x, out_y], axis=1)
    return out_y


if __name__ == "__main__":
    # Small shapes: B=2, T=4, Cin1=Cin2=8, NL=4 -> Cout=8, H=W=16 (HW=256 lanes).
    B, T, Cin1, Cin2, NL, H, W = 2, 4, 8, 8, 4, 16, 16

    key = jax.random.PRNGKey(0)
    k1, k2, kp = jax.random.split(key, 3)
    x1 = jax.random.normal(k1, (B, T, Cin1, H, W), jnp.float32)
    x2 = jax.random.normal(k2, (B, Cin2, H, W), jnp.float32)
    params = init_params(kp, Cin1, Cin2, NL)

    out = jax.block_until_ready(enc_combiner_forward(x1, x2, params))

    assert out.shape == (B, 2, 2 * NL, H, W), out.shape
    assert bool(jnp.all(jnp.isfinite(out)))

    ref = _reference_forward(x1, x2, params)
    # Loose tolerance because the kernel uses the EUP approx reciprocal.
    assert jnp.allclose(out, ref, rtol=2e-2, atol=2e-2), float(
        jnp.max(jnp.abs(out - ref)))

    print("KERNEL_OK")
</pallas_src>

<mosaic_0001>
module attributes {stable_mosaic.version = 11 : i64} {
  func.func @_enc_combiner_kernel(%arg0: i32, %arg1: i32, %arg2: memref<1x4x8x256xf32, #tpu.memory_space<vmem>>, %arg3: memref<1x8x256xf32, #tpu.memory_space<vmem>>, %arg4: memref<8x8xf32, #tpu.memory_space<vmem>>, %arg5: memref<8x1xf32, #tpu.memory_space<vmem>>, %arg6: memref<8x8xf32, #tpu.memory_space<vmem>>, %arg7: memref<8x1xf32, #tpu.memory_space<vmem>>, %arg8: memref<8x8xf32, #tpu.memory_space<vmem>>, %arg9: memref<8x1xf32, #tpu.memory_space<vmem>>, %arg10: memref<1x2x8x256xf32, #tpu.memory_space<vmem>>) attributes {dimension_semantics = [#tpu.dimension_semantics<parallel>, #tpu.dimension_semantics<parallel>], iteration_bounds = array<i64: 2, 1>, scalar_prefetch = 0 : i64, scratch_operands = 0 : i64, tpu.core_type = #tpu.core_type<tc>, window_params = [{transform_indices = @transform_0, window_bounds = array<i64: 1, 4, 8, 256>}, {transform_indices = @transform_1, window_bounds = array<i64: 1, 8, 256>}, {pipeline_mode = #tpu.pipeline_mode<synchronous>, transform_indices = @transform_2, window_bounds = array<i64: 8, 8>}, {pipeline_mode = #tpu.pipeline_mode<synchronous>, transform_indices = @transform_3, window_bounds = array<i64: 8, 1>}, {pipeline_mode = #tpu.pipeline_mode<synchronous>, transform_indices = @transform_4, window_bounds = array<i64: 8, 8>}, {pipeline_mode = #tpu.pipeline_mode<synchronous>, transform_indices = @transform_5, window_bounds = array<i64: 8, 1>}, {pipeline_mode = #tpu.pipeline_mode<synchronous>, transform_indices = @transform_6, window_bounds = array<i64: 8, 8>}, {pipeline_mode = #tpu.pipeline_mode<synchronous>, transform_indices = @transform_7, window_bounds = array<i64: 8, 1>}, {transform_indices = @transform_8, window_bounds = array<i64: 1, 2, 8, 256>}]} {
    %c0 = arith.constant 0 : index
    %c0_0 = arith.constant 0 : index
    %c0_1 = arith.constant 0 : index
    %c0_2 = arith.constant 0 : index
    %0 = vector.load %arg2[%c0, %c0_0, %c0_1, %c0_2] : memref<1x4x8x256xf32, #tpu.memory_space<vmem>>, vector<1x4x8x256xf32>
    %1 = vector.shape_cast %0 : vector<1x4x8x256xf32> to vector<4x8x256xf32>
    %c0_3 = arith.constant 0 : index
    %c0_4 = arith.constant 0 : index
    %c0_5 = arith.constant 0 : index
    %2 = vector.load %arg3[%c0_3, %c0_4, %c0_5] : memref<1x8x256xf32, #tpu.memory_space<vmem>>, vector<1x8x256xf32>
    %3 = vector.shape_cast %2 : vector<1x8x256xf32> to vector<8x256xf32>
    %4 = vector.extract_strided_slice %1 {offsets = [3, 0, 0], sizes = [1, 8, 256], strides = [1, 1, 1]} : vector<4x8x256xf32> to vector<1x8x256xf32>
    %5 = vector.shape_cast %4 : vector<1x8x256xf32> to vector<8x256xf32>
    %c0_6 = arith.constant 0 : index
    %c0_7 = arith.constant 0 : index
    %6 = vector.load %arg6[%c0_6, %c0_7] : memref<8x8xf32, #tpu.memory_space<vmem>>, vector<8x8xf32>
    %cst = arith.constant dense<0.000000e+00> : vector<8x256xf32>
    %7 = tpu.matmul %6, %5, %cst {dimension_numbers = #tpu.dot_dimension_numbers<[1], [0], [0], [1], [0, 0, 1, 1], [], []>} : vector<8x8xf32>, vector<8x256xf32>, vector<8x256xf32> -> vector<8x256xf32>
    %c0_8 = arith.constant 0 : index
    %c0_9 = arith.constant 0 : index
    %8 = vector.load %arg7[%c0_8, %c0_9] : memref<8x1xf32, #tpu.memory_space<vmem>>, vector<8x1xf32>
    %9 = vector.broadcast %8 : vector<8x1xf32> to vector<8x256xf32>
    %10 = arith.addf %7, %9 : vector<8x256xf32>
    %c0_10 = arith.constant 0 : index
    %c0_11 = arith.constant 0 : index
    %11 = vector.load %arg8[%c0_10, %c0_11] : memref<8x8xf32, #tpu.memory_space<vmem>>, vector<8x8xf32>
    %cst_12 = arith.constant dense<0.000000e+00> : vector<8x256xf32>
    %12 = tpu.matmul %11, %3, %cst_12 {dimension_numbers = #tpu.dot_dimension_numbers<[1], [0], [0], [1], [0, 0, 1, 1], [], []>} : vector<8x8xf32>, vector<8x256xf32>, vector<8x256xf32> -> vector<8x256xf32>
    %c0_13 = arith.constant 0 : index
    %c0_14 = arith.constant 0 : index
    %13 = vector.load %arg9[%c0_13, %c0_14] : memref<8x1xf32, #tpu.memory_space<vmem>>, vector<8x1xf32>
    %14 = vector.broadcast %13 : vector<8x1xf32> to vector<8x256xf32>
    %15 = arith.addf %12, %14 : vector<8x256xf32>
    %16 = vector.extract_strided_slice %10 {offsets = [0, 0], sizes = [4, 256], strides = [1, 1]} : vector<8x256xf32> to vector<4x256xf32>
    %17 = vector.extract_strided_slice %10 {offsets = [4, 0], sizes = [4, 256], strides = [1, 1]} : vector<8x256xf32> to vector<4x256xf32>
    %18 = math.exp %17 : vector<4x256xf32>
    %19 = vector.extract_strided_slice %15 {offsets = [0, 0], sizes = [4, 256], strides = [1, 1]} : vector<8x256xf32> to vector<4x256xf32>
    %20 = vector.extract_strided_slice %15 {offsets = [4, 0], sizes = [4, 256], strides = [1, 1]} : vector<8x256xf32> to vector<4x256xf32>
    %21 = math.exp %20 : vector<4x256xf32>
    %22 = arith.addf %18, %21 : vector<4x256xf32>
    %23 = tpu.reciprocal %22 {approx = true} : vector<4x256xf32> -> vector<4x256xf32>
    %24 = arith.mulf %18, %23 : vector<4x256xf32>
    %25 = arith.subf %19, %16 : vector<4x256xf32>
    %26 = arith.mulf %24, %25 : vector<4x256xf32>
    %27 = arith.addf %16, %26 : vector<4x256xf32>
    %cst_15 = arith.constant 1.000000e+00 : f32
    %28 = vector.broadcast %cst_15 : f32 to vector<4x256xf32>
    %29 = arith.subf %28, %24 : vector<4x256xf32>
    %30 = arith.mulf %29, %18 : vector<4x256xf32>
    %31 = math.log %30 : vector<4x256xf32>
    %32 = tpu.concatenate %27, %31 in 0 : vector<4x256xf32>, vector<4x256xf32> -> vector<8x256xf32>
    %c0_16 = arith.constant 0 : index
    %c1 = arith.constant 1 : index
    %c0_17 = arith.constant 0 : index
    %c0_18 = arith.constant 0 : index
    %33 = vector.load %arg10[%c0_16, %c1, %c0_17, %c0_18] : memref<1x2x8x256xf32, #tpu.memory_space<vmem>>, vector<1x1x8x256xf32>
    %34 = vector.shape_cast %33 : vector<1x1x8x256xf32> to vector<8x256xf32>
    %35 = vector.shape_cast %32 : vector<8x256xf32> to vector<1x1x8x256xf32>
    tpu.vector_store %arg10[%c0_16, %c1, %c0_17, %c0_18], %35 {strides = array<i32>} : memref<1x2x8x256xf32, #tpu.memory_space<vmem>>, vector<1x1x8x256xf32>,
    %36 = vector.extract_strided_slice %1 {offsets = [0, 0, 0], sizes = [1, 8, 256], strides = [1, 1, 1]} : vector<4x8x256xf32> to vector<1x8x256xf32>
    %37 = vector.shape_cast %36 : vector<1x8x256xf32> to vector<8x256xf32>
    %c0_19 = arith.constant 0 : index
    %c0_20 = arith.constant 0 : index
    %38 = vector.load %arg4[%c0_19, %c0_20] : memref<8x8xf32, #tpu.memory_space<vmem>>, vector<8x8xf32>
    %cst_21 = arith.constant dense<0.000000e+00> : vector<8x256xf32>
    %39 = tpu.matmul %38, %37, %cst_21 {dimension_numbers = #tpu.dot_dimension_numbers<[1], [0], [0], [1], [0, 0, 1, 1], [], []>} : vector<8x8xf32>, vector<8x256xf32>, vector<8x256xf32> -> vector<8x256xf32>
    %c0_22 = arith.constant 0 : index
    %c0_23 = arith.constant 0 : index
    %40 = vector.load %arg5[%c0_22, %c0_23] : memref<8x1xf32, #tpu.memory_space<vmem>>, vector<8x1xf32>
    %41 = vector.broadcast %40 : vector<8x1xf32> to vector<8x256xf32>
    %42 = arith.addf %39, %41 : vector<8x256xf32>
    %43 = vector.extract_strided_slice %42 {offsets = [0, 0], sizes = [4, 256], strides = [1, 1]} : vector<8x256xf32> to vector<4x256xf32>
    %44 = vector.extract_strided_slice %42 {offsets = [4, 0], sizes = [4, 256], strides = [1, 1]} : vector<8x256xf32> to vector<4x256xf32>
    %45 = math.exp %44 : vector<4x256xf32>
    %46 = vector.extract_strided_slice %1 {offsets = [1, 0, 0], sizes = [1, 8, 256], strides = [1, 1, 1]} : vector<4x8x256xf32> to vector<1x8x256xf32>
    %47 = vector.shape_cast %46 : vector<1x8x256xf32> to vector<8x256xf32>
    %c0_24 = arith.constant 0 : index
    %c0_25 = arith.constant 0 : index
    %48 = vector.load %arg4[%c0_24, %c0_25] : memref<8x8xf32, #tpu.memory_space<vmem>>, vector<8x8xf32>
    %cst_26 = arith.constant dense<0.000000e+00> : vector<8x256xf32>
    %49 = tpu.matmul %48, %47, %cst_26 {dimension_numbers = #tpu.dot_dimension_numbers<[1], [0], [0], [1], [0, 0, 1, 1], [], []>} : vector<8x8xf32>, vector<8x256xf32>, vector<8x256xf32> -> vector<8x256xf32>
    %c0_27 = arith.constant 0 : index
    %c0_28 = arith.constant 0 : index
    %50 = vector.load %arg5[%c0_27, %c0_28] : memref<8x1xf32, #tpu.memory_space<vmem>>, vector<8x1xf32>
    %51 = vector.broadcast %50 : vector<8x1xf32> to vector<8x256xf32>
    %52 = arith.addf %49, %51 : vector<8x256xf32>
    %53 = vector.extract_strided_slice %52 {offsets = [0, 0], sizes = [4, 256], strides = [1, 1]} : vector<8x256xf32> to vector<4x256xf32>
    %54 = vector.extract_strided_slice %52 {offsets = [4, 0], sizes = [4, 256], strides = [1, 1]} : vector<8x256xf32> to vector<4x256xf32>
    %55 = math.exp %54 : vector<4x256xf32>
    %56 = arith.addf %45, %55 : vector<4x256xf32>
    %57 = tpu.reciprocal %56 {approx = true} : vector<4x256xf32> -> vector<4x256xf32>
    %58 = arith.mulf %45, %57 : vector<4x256xf32>
    %59 = arith.subf %53, %43 : vector<4x256xf32>
    %60 = arith.mulf %58, %59 : vector<4x256xf32>
    %61 = arith.addf %43, %60 : vector<4x256xf32>
    %cst_29 = arith.constant 1.000000e+00 : f32
    %62 = vector.broadcast %cst_29 : f32 to vector<4x256xf32>
    %63 = arith.subf %62, %58 : vector<4x256xf32>
    %64 = arith.mulf %63, %45 : vector<4x256xf32>
    %65 = vector.extract_strided_slice %1 {offsets = [2, 0, 0], sizes = [1, 8, 256], strides = [1, 1, 1]} : vector<4x8x256xf32> to vector<1x8x256xf32>
    %66 = vector.shape_cast %65 : vector<1x8x256xf32> to vector<8x256xf32>
    %c0_30 = arith.constant 0 : index
    %c0_31 = arith.constant 0 : index
    %67 = vector.load %arg4[%c0_30, %c0_31] : memref<8x8xf32, #tpu.memory_space<vmem>>, vector<8x8xf32>
    %cst_32 = arith.constant dense<0.000000e+00> : vector<8x256xf32>
    %68 = tpu.matmul %67, %66, %cst_32 {dimension_numbers = #tpu.dot_dimension_numbers<[1], [0], [0], [1], [0, 0, 1, 1], [], []>} : vector<8x8xf32>, vector<8x256xf32>, vector<8x256xf32> -> vector<8x256xf32>
    %c0_33 = arith.constant 0 : index
    %c0_34 = arith.constant 0 : index
    %69 = vector.load %arg5[%c0_33, %c0_34] : memref<8x1xf32, #tpu.memory_space<vmem>>, vector<8x1xf32>
    %70 = vector.broadcast %69 : vector<8x1xf32> to vector<8x256xf32>
    %71 = arith.addf %68, %70 : vector<8x256xf32>
    %72 = vector.extract_strided_slice %71 {offsets = [0, 0], sizes = [4, 256], strides = [1, 1]} : vector<8x256xf32> to vector<4x256xf32>
    %73 = vector.extract_strided_slice %71 {offsets = [4, 0], sizes = [4, 256], strides = [1, 1]} : vector<8x256xf32> to vector<4x256xf32>
    %74 = math.exp %73 : vector<4x256xf32>
    %75 = arith.addf %64, %74 : vector<4x256xf32>
    %76 = tpu.reciprocal %75 {approx = true} : vector<4x256xf32> -> vector<4x256xf32>
    %77 = arith.mulf %64, %76 : vector<4x256xf32>
    %78 = arith.subf %72, %61 : vector<4x256xf32>
    %79 = arith.mulf %77, %78 : vector<4x256xf32>
    %80 = arith.addf %61, %79 : vector<4x256xf32>
    %cst_35 = arith.constant 1.000000e+00 : f32
    %81 = vector.broadcast %cst_35 : f32 to vector<4x256xf32>
    %82 = arith.subf %81, %77 : vector<4x256xf32>
    %83 = arith.mulf %82, %64 : vector<4x256xf32>
    %84 = math.log %83 : vector<4x256xf32>
    %85 = tpu.concatenate %80, %84 in 0 : vector<4x256xf32>, vector<4x256xf32> -> vector<8x256xf32>
    %c0_36 = arith.constant 0 : index
    %c0_37 = arith.constant 0 : index
    %c0_38 = arith.constant 0 : index
    %c0_39 = arith.constant 0 : index
    %86 = vector.load %arg10[%c0_36, %c0_37, %c0_38, %c0_39] : memref<1x2x8x256xf32, #tpu.memory_space<vmem>>, vector<1x1x8x256xf32>
    %87 = vector.shape_cast %86 : vector<1x1x8x256xf32> to vector<8x256xf32>
    %88 = vector.shape_cast %85 : vector<8x256xf32> to vector<1x1x8x256xf32>
    tpu.vector_store %arg10[%c0_36, %c0_37, %c0_38, %c0_39], %88 {strides = array<i32>} : memref<1x2x8x256xf32, #tpu.memory_space<vmem>>, vector<1x1x8x256xf32>,
    return
  }
  func.func @transform_0(%arg0: i32, %arg1: i32) -> (i32, i32, i32, i32) {
    %c0_i32 = arith.constant 0 : i32
    %c0_i32_0 = arith.constant 0 : i32
    %c0_i32_1 = arith.constant 0 : i32
    return %arg0, %c0_i32, %c0_i32_0, %arg1 : i32, i32, i32, i32
  }
  func.func @transform_1(%arg0: i32, %arg1: i32) -> (i32, i32, i32) {
    %c0_i32 = arith.constant 0 : i32
    %c0_i32_0 = arith.constant 0 : i32
    return %arg0, %c0_i32, %arg1 : i32, i32, i32
  }
  func.func @transform_2(%arg0: i32, %arg1: i32) -> (i32, i32) {
    %c0_i32 = arith.constant 0 : i32
    %c0_i32_0 = arith.constant 0 : i32
    %c0_i32_1 = arith.constant 0 : i32
    return %c0_i32, %c0_i32_0 : i32, i32
  }
  func.func @transform_3(%arg0: i32, %arg1: i32) -> (i32, i32) {
    %c0_i32 = arith.constant 0 : i32
    %c0_i32_0 = arith.constant 0 : i32
    %c0_i32_1 = arith.constant 0 : i32
    return %c0_i32, %c0_i32_0 : i32, i32
  }
  func.func @transform_4(%arg0: i32, %arg1: i32) -> (i32, i32) {
    %c0_i32 = arith.constant 0 : i32
    %c0_i32_0 = arith.constant 0 : i32
    %c0_i32_1 = arith.constant 0 : i32
    return %c0_i32, %c0_i32_0 : i32, i32
  }
  func.func @transform_5(%arg0: i32, %arg1: i32) -> (i32, i32) {
    %c0_i32 = arith.constant 0 : i32
    %c0_i32_0 = arith.constant 0 : i32
    %c0_i32_1 = arith.constant 0 : i32
    return %c0_i32, %c0_i32_0 : i32, i32
  }
  func.func @transform_6(%arg0: i32, %arg1: i32) -> (i32, i32) {
    %c0_i32 = arith.constant 0 : i32
    %c0_i32_0 = arith.constant 0 : i32
    %c0_i32_1 = arith.constant 0 : i32
    return %c0_i32, %c0_i32_0 : i32, i32
  }
  func.func @transform_7(%arg0: i32, %arg1: i32) -> (i32, i32) {
    %c0_i32 = arith.constant 0 : i32
    %c0_i32_0 = arith.constant 0 : i32
    %c0_i32_1 = arith.constant 0 : i32
    return %c0_i32, %c0_i32_0 : i32, i32
  }
  func.func @transform_8(%arg0: i32, %arg1: i32) -> (i32, i32, i32, i32) {
    %c0_i32 = arith.constant 0 : i32
    %c0_i32_0 = arith.constant 0 : i32
    %c0_i32_1 = arith.constant 0 : i32
    return %arg0, %c0_i32, %c0_i32_0, %arg1 : i32, i32, i32, i32
  }
}

</mosaic_0001>

<bundles_post_ra>
// kernel: tpu_custom_call.1
= control target key start
LH: loop header
LB: loop body
LE: loop exit
PB: predicated region body
PF: predicated region fallthrough
CT: control target
= control target key end

     0   :  { %s1670_s0 = inlined_call_operand.hbm [shape: f32[2,4,8,256], index: 0, kind: input, shape index: {}]   ;;  %s1671_s1 = inlined_call_operand.hbm [shape: f32[2,8,256], index: 1, kind: input, shape index: {}]   ;;  %s1672_s2 = inlined_call_operand.vmem [shape: f32[8,8], index: 2, kind: input, shape index: {}]   ;;  %s1673_s3 = inlined_call_operand.vmem [shape: f32[8,1], index: 3, kind: input, shape index: {}]   ;;  %s1674_s4 = inlined_call_operand.vmem [shape: f32[8,8], index: 4, kind: input, shape index: {}]   ;;  %s1675_s5 = inlined_call_operand.vmem [shape: f32[8,1], index: 5, kind: input, shape index: {}]   ;;  %s1676_s6 = inlined_call_operand.vmem [shape: f32[8,8], index: 6, kind: input, shape index: {}]   ;;  %s1677_s7 = inlined_call_operand.vmem [shape: f32[8,1], index: 7, kind: input, shape index: {}]   ;;  %s1678_s8 = inlined_call_operand.hbm [shape: f32[2,2,8,256], index: 8, kind: output, shape index: {}]  }
   0x1   :  { %1683 = sst [smem:[#allocation14_spill]] %s1670_s0 }
   0x2   :  { %13 = vsyncpa [#allocation3], 0 }
   0x3   :  { %15 = vsyncpa [#allocation3 + $0x1], 0 }
   0x4   :  { %16 = vsyncpa [#allocation6], 0 }
   0x5   :  { %18 = vsyncpa [#allocation6 + $0x1], 0 }
   0x6   :  { %19 = vsyncpa [#allocation4], 0 }
   0x7   :  { %21 = vsyncpa [#allocation4 + $0x1], 0  ;;  %s1380_s27 = smov 0   ;;  %s1382_s28 = smov 0  }
   0x8   :  { %s1384_s29 = smov 0   ;;  %s1386_s30 = smov 0  }
   0x9   :  { %s1388_s9 = smov 0   ;;  %s1390_s10 = smov 0  }
   0xa LB: > { %1684 = sst [smem:[#allocation11_spill]] %s1312_s29  ;;  %s1034_s11 = sadd.s32 4294967295, %s1324_s10   ;;  %s1324_s10 = sphi %s1390_s10, %s27_s10   ;;  %s1320_s9 = sphi %s1388_s9, %s1707_s9   ;;  %s1316_s30 = sphi %s1386_s30, %s1706_s30   ;;  %s1312_s29 = sphi %s1384_s29, %s1702_s29   ;;  %s1308_s28 = sphi %s1382_s28, %s1705_s28   ;;  %s1304_s27 = sphi %s1380_s27, %s1704_s27  }
   0xb   : > { %s1035_s12 = sadd.s32 4294967294, %s1324_s10   ;;  %s39_s13 = sadd.s32 1, %s1320_s9 }
   0xc   : > { %s48_s14 = sadd.s32 1, %s1312_s29  ;;  %p41_p0 = scmp.ge.s32.totalorder %s39_s13, 2 }
   0xd   : > { %p55_p1 = scmp.ne.s32.totalorder %s1312_s29, %s1308_s28  ;;  %p56_p2 = scmp.eq.s32.totalorder %s1324_s10, 0 }
   0xe   : > { %p61_p3 = scmp.ne.s32.totalorder %s1308_s28, %s1304_s27  ;;  %s1709_s13 = smov (%p41_p0, %s39_s13), 0 }
   0xf   : > { %1685 = sst [smem:[#allocation12_spill]] %s1709_s13  ;;  %p1421_p4 = por %p56_p2, %p55_p1 }
  0x10   : > { %p62_p5 = scmp.eq.s32.totalorder %s1034_s11, 0  ;;  %s43_s16 = ssub.s32 %s1320_s9, %s1709_s13 }
  0x11   : > { %p241_p6 = scmp.eq.s32.totalorder %s1034_s11, 1  ;;  %p46_p7 = scmp.eq.s32.totalorder %s43_s16, 0 }
  0x12   : > { %p1427_p8 = por %p62_p5, %p61_p3  ;;  %p247_p10 = scmp.eq.s32.totalorder %s1035_s12, 1 }
  0x13   : > { %p1431_p9 = por %p241_p6, %p55_p1  ;;  %p1080_p13 = scmp.lt.s32.totalorder %s1324_s10, 2 }
  0x14   : > { %s1687_s17 = scalar_select %p1427_p8, 1, 0 }
  0x15   : > { %s1688_s18 = scalar_select %p1431_p9, 1, 0 }
  0x16   : > { %s1436_s19 = scalar_select %p46_p7, %s1312_s29, %s48_s14  }
  0x17   : > { %p1438_p11 = por %p247_p10, %p61_p3  ;;  %s1445_s21 = sand.u32 1, %s1312_s29  }
  0x18   : > { %1689 = sst [smem:[#allocation13_spill]] %s1436_s19  ;;  %s1038_s22 = sshll.u32 %s1445_s21, 6 }
  0x19   : > { %s1690_s20 = scalar_select %p1438_p11, 1, 0 }
  0x1a   : > { %s1060_s23 = sshll.u32 %s1320_s9, 10  ;;  %s1691_s0 = sld [smem:[#allocation14_spill]] }
  0x1b   : > { %s289_s11 = scalar_lea.vmem [#allocation2], %s1038_s22  ;;  %p1458_p0 = pnand %p1080_p13, %p1421_p4 }
  0x1c   : > { %s298_s12 = sshll.u32 %s289_s11, 4  ;;  %s1454_s12 = int_to_ptr.vmem [resolvable:$true] %s298_s12 }
  0x1d   : > { %p1180_p3 = pneg %p1458_p0 }
  0x20   : > { %s1452_s26 = scalar_lea.hbm %s1691_s0, %s1060_s23  ;;  %s1183_s15 = scalar_lea.hbm %s1691_s0, 2048 }
  0x21   : > { %s1178_s24 = scalar_lea.hbm %s1452_s26, 1024  ;;  %p1184_p4 = scmp.lt.u32.totalorder %s1452_s26, %s1691_s0 }
  0x22   : > { %p1179_p2 = scmp.ne.s32.totalorder %s1452_s26, %s1178_s24  ;;  %p1185_p7 = scmp.lt.u32.totalorder %s1183_s15, %s1178_s24 }
  0x23   : > { %p1187_p13 = scmp.lt.u32.totalorder %s1178_s24, %s1452_s26 }
  0x24   : > { %p1181_p5 = pnand %p1180_p3, %p1179_p2  ;;  %p1186_p10 = por %p1185_p7, %p1184_p4 }
  0x26   : > { %p1182_p6 = pneg %p1181_p5  ;;  %p1188_p12 = por %p1187_p13, %p1186_p10 }
  0x28   : > { %p1189_p1 = pnand %p1188_p12, %p1182_p6 }
  0x2a   : > { %1192 = shalt.err (!%p1189_p1)
}
  0x2b   : > { %s1193_s16 = scalar_lea.vmem %s1454_s12, 1024  ;;  %s1326_s22 = smov [#allocation2]  }
  0x2c   : > { %p1194_p2 = scmp.ne.s32.totalorder %s1454_s12, %s1193_s16  ;;  %s1198_s23 = sshll.u32 %s1326_s22, 4  ;;  %s1199_s23 = int_to_ptr.vmem [resolvable:$false] %s1198_s23 }
  0x2d   : > { %s1200_s25 = scalar_lea.vmem %s1199_s23, 2048  ;;  %p1201_p9 = scmp.lt.s32.totalorder %s1454_s12, %s1199_s23 }
  0x2e   : > { %p1196_p5 = pnand %p1194_p2, %p1180_p3  ;;  %p1202_p4 = scmp.lt.s32.totalorder %s1200_s25, %s1193_s16 }
  0x30   : > { %p1197_p11 = pneg %p1196_p5  ;;  %p1203_p7 = por %p1202_p4, %p1201_p9 }
  0x32   : > { %p1204_p10 = pnand %p1203_p7, %p1197_p11 }
  0x34   : > { %1207 = shalt.err (!%p1204_p10)
}
  0x35   : > { %s1327_s24 = smov 256   ;;  %s1328_s15 = smov 16  }
  0x36   : > { %s1693_s11 = scalar_lea.sflag [#allocation3], %s1445_s21  ;;  %p327_p12 = scmp.lt.s32.totalorder %s1324_s10, 3 }
  0x37   : > { %1072 = dma.hbm_to_vmem [thread:$0]  (!%p1458_p0), %s1452_s26, 1024, %s1454_s12, %s1693_s11, %s1327_s24, %s1327_s24, %s1328_s15  }
  0x38   : > { %s1041_s16 = sshll.u32 %s1445_s21, 4  ;;  %s1061_s22 = sshll.u32 %s1320_s9, 8 }
  0x39   : > { %p1694_p9 = scmp.ge.s32.totalorder %s1324_s10, 1  ;;  %s1503_s13 = scalar_lea.hbm %s1671_s1, %s1061_s22 }
  0x3a   : > { %s312_s19 = scalar_lea.vmem [#allocation5], %s1041_s16  ;;  %s309_s26 = scalar_lea.sflag [#allocation6], %s1445_s21 }
  0x3b   : > { %p1496_p11 = pnand %p1694_p9, %p327_p12  ;;  %s322_s29 = sshll.u32 %s312_s19, 4  ;;  %s323_s29 = int_to_ptr.vmem [resolvable:$true] %s322_s29 }
  0x3c   : > { %s1208_s12 = scalar_lea.hbm %s1503_s13, 256  ;;  %s1213_s0 = scalar_lea.hbm %s1671_s1, 512 }
  0x3d   : > { %s1695_s23 = scalar_select %p1496_p11, 1, 0 }
  0x3e   : > { %p1209_p1 = scmp.ne.s32.totalorder %s1503_s13, %s1208_s12  ;;  %p1214_p2 = scmp.lt.u32.totalorder %s1503_s13, %s1671_s1 }
  0x3f   : > { %p1215_p5 = scmp.lt.u32.totalorder %s1213_s0, %s1208_s12  ;;  %p1217_p7 = scmp.lt.u32.totalorder %s1208_s12, %s1503_s13 }
  0x40   : > { %p1211_p6 = pnand %p1209_p1, %p1180_p3 }
  0x41   : > { %p1216_p4 = por %p1215_p5, %p1214_p2 }
  0x42   : > { %p1212_p13 = pneg %p1211_p6 }
  0x43   : > { %p1218_p10 = por %p1217_p7, %p1216_p4 }
  0x45   : > { %p1219_p12 = pnand %p1218_p10, %p1212_p13 }
  0x47   : > { %1222 = shalt.err (!%p1219_p12)
}
  0x48   : > { %s1223_s19 = scalar_lea.vmem %s323_s29, 256  ;;  %s1329_s21 = smov [#allocation5]  }
  0x49   : > { %p1224_p9 = scmp.ne.s32.totalorder %s323_s29, %s1223_s19  ;;  %s1228_s16 = sshll.u32 %s1329_s21, 4  ;;  %s1229_s16 = int_to_ptr.vmem [resolvable:$false] %s1228_s16 }
  0x4a   : > { %s1230_s25 = scalar_lea.vmem %s1229_s16, 512  ;;  %p1231_p8 = scmp.lt.s32.totalorder %s323_s29, %s1229_s16 }
  0x4b   : > { %p1226_p1 = pnand %p1224_p9, %p1180_p3  ;;  %p1232_p11 = scmp.lt.s32.totalorder %s1230_s25, %s1223_s19 }
  0x4d   : > { %p1227_p6 = pneg %p1226_p1  ;;  %p1233_p2 = por %p1232_p11, %p1231_p8 }
  0x4f   : > { %p1234_p5 = pnand %p1233_p2, %p1227_p6 }
  0x51   : > { %1237 = shalt.err (!%p1234_p5)
}
  0x52   : > { %1075 = dma.hbm_to_vmem [thread:$0]  (!%p1458_p0), %s1503_s13, 256, %s323_s29, %s309_s26  }
  0x53   : > { %p1696_p13 = scmp.ne.s32.totalorder %s1695_s23, 0 }
  0x54   : > { %s1528_s12 = sand.u32 (!%p1696_p13), 1, %s1308_s28   ;;  %p1697_p8 = scmp.ne.s32.totalorder (!%p1696_p13), %s1687_s17, 0 }
  0x55   : > { %331 = sbr.rel (%p1696_p13) target bundleno = 403 (0x193), region = 52  ;;  %s1045_s24 = sshll.u32 (!%p1696_p13), %s1528_s12, 6 }
  0x56   : > { %s334_s15 = scalar_lea.sflag (!%p1696_p13), [#allocation3], %s1528_s12  ;;  %s1532_s0 = scalar_lea.vmem (!%p1696_p13), [#allocation2], %s1045_s24 }
  0x5c   : > { %1291 = dma.done.wait (%p1697_p8), %s334_s15, 1024  }
  0x5d   : > { %1293 = vsyncadd (%p1697_p8), %s334_s15, 4294966272  ;;  %s1046_s29 = sshll.u32 %s1528_s12, 4  ;;  %s343_s13 = scalar_lea.sflag [#allocation6], %s1528_s12 }
  0x5e   : > { %s346_s14 = scalar_lea.vmem [#allocation5], %s1046_s29 }
  0x5f   : > { %1295 = dma.done.wait (%p1697_p8), %s343_s13, 256  }
  0x60   : > { %1297 = vsyncadd (%p1697_p8), %s343_s13, 4294967040  ;;  %v1330_v0 = vmov 0.0   ;;  %v1331_v1 = vmov 0   ;;  %v394_v2 = vld [vmem:[%s1532_s0 + $0x38] sm:$0xff]  ;;  %v393_v4 = vld [vmem:[%s1532_s0 + $0x30] sm:$0xff]  ;;  %vm404_vm0 = vcmask 64512  }
  0x61   : > { %472 = vmatprep.mubr.f32.mxu0 %v1330_v0  ;;  %553 = vmatprep.mubr.f32.mxu1 %v1330_v0  ;;  %v396_v3 = vld [vmem:[%s346_s14 + $0x8] sm:$0xff]  ;;  %v395_v5 = vld [vmem:[%s346_s14] sm:$0xff]  ;;  %vm600_vm1 = vcmask 1043456   ;;  %s1062_s14 = sshll.u32 %s1316_s30, 9  ;;  %s906_s30 = scalar_lea.sflag [#allocation4], %s1528_s12 }
  0x62   : > { %1136 = vset.pattern.permute.xlu0 %v1331_v1  ;;  %1137 = vset.pattern.permute.xlu1 %v1331_v1  ;;  %v397_v6 = vld [vmem:[%s1674_s4] sm:$0xff]  ;;  %v388_v8 = vld [vmem:[%s1532_s0 + $0x8] sm:$0xff]  ;;  %v390_v9 = vld [vmem:[%s1532_s0 + $0x18] sm:$0xff]  ;;  %s1616_s11 = scalar_lea.hbm %s1678_s8, %s1062_s14  ;;  %p1698_p3 = scmp.ne.s32.totalorder %s1688_s18, 0 }
  0x63   : > { %408 = vmatprep.subr.mxu0 %v394_v2  ;;  %489 = vmatprep.subr.mxu1 %v396_v3  ;;  %v479_v7 = vld [vmem:[%s1676_s6] sm:$0xff]  ;;  %v389_v11 = vld [vmem:[%s1532_s0 + $0x10] sm:$0xff]  ;;  %v392_v13 = vld [vmem:[%s1532_s0 + $0x28] sm:$0xff]  ;;  %s1332_s19 = smov [#allocation7]  }
  0x64   : > { %409 = vmatpush1.msra.mxu0 %v393_v4  ;;  %490 = vmatpush1.msra.mxu1 %v395_v5  ;;  %v387_v10 = vld [vmem:[%s1532_s0] sm:$0xff]  ;;  %s1242_s21 = sshll.u32 %s1332_s19, 4  ;;  %s1243_s21 = int_to_ptr.vmem [resolvable:$false] %s1242_s21 }
  0x65   : > { %1048 = vmatmul.mubr.msk.f32.vlgmr.msra.gmra.mrb[0].mxu0 %vm404_vm0, %v397_v6  ;;  %1049 = vmatmul.mubr.msk.f32.vlgmr.msra.gmra.mrb[0].mxu1 %vm404_vm0, %v479_v7  ;;  %v606_v12 = vld [vmem:[%s1672_s2] sm:$0xff]  ;;  %s1244_s16 = scalar_lea.vmem %s1243_s21, 1024 }
  0x66   : > { %616 = vmatprep.subr.mxu0 %v388_v8  ;;  %691 = vmatprep.subr.mxu1 %v390_v9  ;;  %v391_v14 = vld [vmem:[%s1532_s0 + $0x20] sm:$0xff]  ;;  %s1047_s0 = sshll.u32 %s1528_s12, 5 }
  0x67   : > { %617 = vmatpush1.msra.mxu0 %v387_v10  ;;  %692 = vmatpush1.msra.mxu1 %v389_v11  ;;  %v607_v15 = vld [vmem:[%s1673_s3] sm:$0xff]  ;;  %s1605_s13 = scalar_lea.vmem [#allocation7], %s1047_s0 }
  0x68   : > { %680 = vmatprep.mubr.f32.mxu0 %v1330_v0  ;;  %755 = vmatprep.mubr.f32.mxu1 %v1330_v0  ;;  %v480_v16 = vld [vmem:[%s1677_s7] sm:$0xff]  ;;  %s921_s17 = sshll.u32 %s1605_s13, 4  ;;  %s1618_s17 = int_to_ptr.vmem [resolvable:$true] %s921_s17 }
  0x69   : > { %1052 = vmatmul.mubr.msk.f32.vlgmr.msra.gmra.mrb[2].mxu0 %vm404_vm0, %v606_v12  ;;  %1053 = vmatmul.mubr.msk.f32.vlgmr.msra.gmra.mrb[2].mxu1 %vm404_vm0, %v606_v12  ;;  %v398_v17 = vld [vmem:[%s1675_s5] sm:$0xff]  ;;  %s1238_s22 = scalar_lea.vmem %s1618_s17, 512  ;;  %p1245_p7 = scmp.lt.s32.totalorder %s1618_s17, %s1243_s21 }
  0x6a   : > { %794 = vmatprep.subr.mxu0 %v392_v13  ;;  %858 = vmatprep.mubr.f32.mxu0 %v1330_v0  ;;  %p1239_p0 = scmp.ne.s32.totalorder %s1618_s17, %s1238_s22  ;;  %p1246_p10 = scmp.lt.s32.totalorder %s1244_s16, %s1238_s22 }
  0x6b   : > { %795 = vmatpush1.msra.mxu0 %v391_v14  ;;  %610 = vperm.xlu0 %1136, %v607_v15  }
  0x6c   : > { %483 = vperm.xlu1 %1137, %v480_v16   ;;  %p1240_p11 = pnand %p1239_p0, %p1698_p3  ;;  %p1247_p12 = por %p1246_p10, %p1245_p7 }
  0x6d   : > { %1054 = vmatmul.mubr.msk.f32.vlgmr.msra.gmra.mrb[4].mxu0 %vm404_vm0, %v606_v12 }
  0x6e   : > { %p1241_p4 = pneg %p1240_p11 }
  0x6f   : > { %401 = vperm.xlu0 %1136, %v398_v17  }
  0x70   : > { %p1248_p9 = pnand %p1247_p12, %p1241_p4 }
  0xea   : > { %v611_v18 = vpop.permute.xlu0 %610 }
  0xeb   : > { %v484_v19 = vpop.permute.xlu1 %483 }
  0xee   : > { %v402_v20 = vpop.permute.xlu0 %401 }
 0x138   : > { %v474_v21 = vpop.f32.mrb[0].mxu0  ;;  %v555_v22 = vpop.f32.mrb[0].mxu1 }
 0x139   : > { %v1575_v23 = vadd.f32 %v474_v21, %v402_v20  ;;  %v556_v24 = vadd.f32 %v555_v22, %v484_v19  ;;  %v476_v25 = vpop.f32.mrb[1].mxu0  ;;  %v557_v26 = vpop.f32.mrb[1].mxu1 }
 0x13a   : > { %v1577_v27 = vadd.f32 %v476_v25, %v402_v20  ;;  %v558_v28 = vadd.f32 %v557_v26, %v484_v19 }
 0x13b   : > { %v560_v29 = vmul.f32 1.442695, %v1575_v23  ;;  %v564_v30 = vmul.f32 1.442695, %v556_v24  ;;  %v574_v31 = vsub.f32 %v556_v24, %v1575_v23 }
 0x13c   : > { %v562_v32 = vmul.f32 1.442695, %v1577_v27  ;;  %v566_v33 = vmul.f32 1.442695, %v558_v28  ;;  %v575_v34 = vsub.f32 %v558_v28, %v1577_v27  ;;  %v682_v35 = vpop.f32.mrb[2].mxu0  ;;  %v757_v36 = vpop.f32.mrb[2].mxu1 }
 0x13d   : > { %1138 = vpow2.f32 %v560_v29  ;;  %v1583_v37 = vadd.f32 %v682_v35, %v611_v18  ;;  %v758_v38 = vadd.f32 %v757_v36, %v611_v18  ;;  %v684_v39 = vpop.f32.mrb[3].mxu0  ;;  %v759_v40 = vpop.f32.mrb[3].mxu1  ;;  %v578_v5 = vrot.slane %v574_v31, 4 }
 0x13e   : > { %1140 = vpow2.f32 %v564_v30  ;;  %v1585_v41 = vadd.f32 %v684_v39, %v611_v18  ;;  %v760_v42 = vadd.f32 %v759_v40, %v611_v18  ;;  %v579_v7 = vrot.slane %v575_v34, 4 }
 0x13f   : > { %1142 = vpow2.f32 %v562_v32  ;;  %v687_v43 = vmul.f32 1.442695, %v1583_v37  ;;  %v762_v44 = vmul.f32 1.442695, %v758_v38  ;;  %v772_v45 = vsub.f32 %v758_v38, %v1583_v37 }
 0x140   : > { %1144 = vpow2.f32 %v566_v33  ;;  %v689_v46 = vmul.f32 1.442695, %v1585_v41  ;;  %v764_v47 = vmul.f32 1.442695, %v760_v42  ;;  %v773_v48 = vsub.f32 %v760_v42, %v1585_v41  ;;  %v860_v49 = vpop.f32.mrb[4].mxu0 }
 0x141   : > { %1146 = vpow2.f32 %v687_v43  ;;  %v862_v50 = vpop.f32.mrb[5].mxu0  ;;  %v1591_v62 = vadd.f32 %v860_v49, %v611_v18 }
 0x142   : > { %1148 = vpow2.f32 %v762_v44  ;;  %v1593_v0 = vadd.f32 %v862_v50, %v611_v18  ;;  %v776_v18 = vrot.slane %v772_v45, 4  ;;  %v777_v26 = vrot.slane %v773_v48, 4 }
 0x143   : > { %1150 = vpow2.f32 %v689_v46  ;;  %v865_v1 = vmul.f32 1.442695, %v1591_v62 }
 0x144   : > { %1152 = vpow2.f32 %v764_v47  ;;  %v867_v2 = vmul.f32 1.442695, %v1593_v0 }
 0x147   : > { %v1139_v51 = vpop.eup %1138 }
 0x148   : > { %v1141_v52 = vpop.eup %1140 }
 0x149   : > { %v1143_v53 = vpop.eup %1142  ;;  %v568_v54 = vadd.f32 %v1141_v52, %v1139_v51 }
 0x14a   : > { %v1145_v55 = vpop.eup %1144 }
 0x14b   : > { %v1147_v56 = vpop.eup %1146  ;;  %1154 = vrcp.f32 %v568_v54  ;;  %v569_v57 = vadd.f32 %v1145_v55, %v1143_v53 }
 0x14c   : > { %v1149_v58 = vpop.eup %1148 }
 0x14d   : > { %v1151_v59 = vpop.eup %1150  ;;  %1156 = vrcp.f32 %v569_v57  ;;  %v766_v60 = vadd.f32 %v1149_v58, %v1147_v56 }
 0x14e   : > { %v1153_v61 = vpop.eup %1152 }
 0x14f   : > { %1158 = vrcp.f32 %v766_v60  ;;  %v767_v63 = vadd.f32 %v1153_v61, %v1151_v59 }
 0x151   : > { %1160 = vrcp.f32 %v767_v63 }
 0x152   : > { %1162 = vpow2.f32 %v865_v1 }
 0x153   : > { %1164 = vpow2.f32 %v867_v2 }
 0x155   : > { %v1155_v3 = vpop.eup %1154 }
 0x156   : > { %v572_v4 = vmul.f32 %v1155_v3, %v1139_v51 }
 0x157   : > { %v1157_v6 = vpop.eup %1156 }
 0x158   : > { %v582_v8 = vmul.f32 %v578_v5, %v572_v4  ;;  %v592_v9 = vsub.f32 1.0, %v572_v4  ;;  %v573_v10 = vmul.f32 %v1157_v6, %v1143_v53 }
 0x159   : > { %v1159_v11 = vpop.eup %1158 }
 0x15a   : > { %v586_v12 = vrot.slane %v582_v8, 4  ;;  %v594_v13 = vmul.f32 %v1139_v51, %v592_v9  ;;  %v583_v14 = vmul.f32 %v579_v7, %v573_v10  ;;  %v593_v15 = vsub.f32 1.0, %v573_v10 }
 0x15b   : > { %v1161_v16 = vpop.eup %1160  ;;  %v770_v17 = vmul.f32 %v1159_v11, %v1147_v56 }
 0x15c   : > { %v590_v19 = vadd.f32 %v586_v12, %v1575_v23  ;;  %1166 = vlog2.f32 %v594_v13  ;;  %v587_v20 = vrot.slane %v583_v14, 4  ;;  %v595_v21 = vmul.f32 %v1143_v53, %v593_v15  ;;  %v1163_v33 = vpop.eup %1162 }
 0x15d   : > { %v780_v22 = vmul.f32 %v776_v18, %v770_v17  ;;  %v790_v24 = vsub.f32 1.0, %v770_v17  ;;  %v771_v25 = vmul.f32 %v1161_v16, %v1151_v59  ;;  %v1165_v38 = vpop.eup %1164 }
 0x15e   : > { %v591_v28 = vadd.f32 %v587_v20, %v1577_v27  ;;  %1168 = vlog2.f32 %v595_v21 }
 0x15f   : > { %v784_v29 = vrot.slane %v780_v22, 4  ;;  %v792_v30 = vmul.f32 %v1147_v56, %v790_v24  ;;  %v781_v31 = vmul.f32 %v777_v26, %v771_v25  ;;  %v791_v32 = vsub.f32 1.0, %v771_v25 }
 0x161   : > { %v785_v34 = vrot.slane %v781_v31, 4  ;;  %v793_v35 = vmul.f32 %v1151_v59, %v791_v32  ;;  %v788_v23 = vadd.f32 %v784_v29, %v1583_v37  ;;  %v869_v36 = vadd.f32 %v1163_v33, %v792_v30 }
 0x163   : > { %1170 = vrcp.f32 %v869_v36  ;;  %v875_v39 = vsub.f32 %v1591_v62, %v788_v23  ;;  %v789_v40 = vadd.f32 %v785_v34, %v1585_v41  ;;  %v870_v42 = vadd.f32 %v1165_v38, %v793_v35 }
 0x165   : > { %1172 = vrcp.f32 %v870_v42  ;;  %v876_v27 = vsub.f32 %v1593_v0, %v789_v40  ;;  %v879_v49 = vrot.slane %v875_v39, 4 }
 0x166   : > { %v1167_v43 = vpop.eup %1166 }
 0x167   : > { %v597_v44 = vmul.f32 0.6931472, %v1167_v43  ;;  %v880_v54 = vrot.slane %v876_v27, 4 }
 0x168   : > { %v1169_v45 = vpop.eup %1168 }
 0x169   : > { %v601_v46 = vsel %vm600_vm1, %v590_v19, %v597_v44  ;;  %v599_v47 = vmul.f32 0.6931472, %v1169_v45 }
 0x16a   : > { %1050 = vst [vmem:[%s1605_s13 + $0x10] sm:$0xff] %v601_v46 }
 0x16b   : > { %v602_v37 = vsel %vm600_vm1, %v591_v28, %v599_v47 }
 0x16c   : > { %1051 = vst [vmem:[%s1605_s13 + $0x18] sm:$0xff] %v602_v37 }
 0x16d   : > { %v1171_v41 = vpop.eup %1170 }
 0x16e   : > { %v873_v48 = vmul.f32 %v1171_v41, %v792_v30 }
 0x16f   : > { %v1173_v50 = vpop.eup %1172 }
 0x170   : > { %v883_v51 = vmul.f32 %v879_v49, %v873_v48  ;;  %v893_v52 = vsub.f32 1.0, %v873_v48  ;;  %v874_v53 = vmul.f32 %v1173_v50, %v793_v35 }
 0x172   : > { %v887_v55 = vrot.slane %v883_v51, 4  ;;  %v895_v56 = vmul.f32 %v893_v52, %v792_v30  ;;  %v884_v57 = vmul.f32 %v880_v54, %v874_v53  ;;  %v894_v58 = vsub.f32 1.0, %v874_v53 }
 0x174   : > { %v891_v59 = vadd.f32 %v887_v55, %v788_v23  ;;  %1174 = vlog2.f32 %v895_v56  ;;  %v888_v60 = vrot.slane %v884_v57, 4  ;;  %v896_v61 = vmul.f32 %v894_v58, %v793_v35 }
 0x176   : > { %v892_v62 = vadd.f32 %v888_v60, %v789_v40  ;;  %1176 = vlog2.f32 %v896_v61 }
 0x17e   : > { %v1175_v63 = vpop.eup %1174 }
 0x17f   : > { %v898_v0 = vmul.f32 0.6931472, %v1175_v63 }
 0x180   : > { %v1177_v1 = vpop.eup %1176 }
 0x181   : > { %v901_v2 = vsel %vm600_vm1, %v891_v59, %v898_v0  ;;  %v900_v3 = vmul.f32 0.6931472, %v1177_v1 }
 0x182   : > { %903 = vst [vmem:[%s1605_s13] sm:$0xff] %v901_v2 }
 0x183   : > { %v902_v4 = vsel %vm600_vm1, %v892_v62, %v900_v3 }
 0x184   : > { %904 = vst [vmem:[%s1605_s13 + $0x8] sm:$0xff] %v902_v4 }
 0x185   : > { %1251 = shalt.err (!%p1248_p9)
}
 0x186   : > { %s1252_s25 = scalar_lea.hbm %s1616_s11, 512  ;;  %s1256_s29 = scalar_lea.hbm %s1678_s8, 1024 }
 0x187   : > { %p1253_p1 = scmp.ne.s32.totalorder %s1616_s11, %s1252_s25  ;;  %p1257_p5 = scmp.lt.u32.totalorder %s1616_s11, %s1678_s8 }
 0x188   : > { %p1258_p13 = scmp.lt.u32.totalorder %s1256_s29, %s1252_s25  ;;  %p1260_p0 = scmp.lt.u32.totalorder %s1252_s25, %s1616_s11 }
 0x189   : > { %p1254_p6 = pnand %p1253_p1, %p1698_p3 }
 0x18a   : > { %p1259_p8 = por %p1258_p13, %p1257_p5 }
 0x18b   : > { %p1255_p2 = pneg %p1254_p6 }
 0x18c   : > { %p1261_p11 = por %p1260_p0, %p1259_p8 }
 0x18e   : > { %p1262_p4 = pnand %p1261_p11, %p1255_p2 }
 0x190   : > { %1265 = shalt.err (!%p1262_p4)
}
 0x191   : > { %s1333_s14 = smov 256   ;;  %s1334_s23 = smov 16  }
 0x192   : > { %1067 = dma.vmem_to_hbm [thread:$0]  (%p1698_p3), %s1618_s17, 512, %s1616_s11, %s906_s30, %s1333_s14, %s1333_s14, %s1334_s23  }
 0x193 PF: > { %s936_s26 = sand.u32 1, %s1304_s27   ;;  %p1699_p7 = scmp.ne.s32.totalorder %s1690_s20, 0 }
 0x194   : > { %p1700_p10 = scmp.ge.s32.totalorder %s1324_s10, 2  ;;  %s937_s22 = scalar_lea.sflag [#allocation4], %s936_s26 }
 0x196   : > { %p1077_p12 = pnand %p1700_p10, %p1699_p7 }
 0x198   : > { %1299 = dma.done.wait (!%p1077_p12), %s937_s22, 512  }
 0x199   : > { %1301 = vsyncadd (!%p1077_p12), %s937_s22, 4294966784  ;;  %s27_s10 = sadd.s32 1, %s1324_s10   ;;  %s1701_s19 = sld [smem:[#allocation11_spill]] }
 0x19a   : > { %p24_p9 = scmp.ge.s32.totalorder %s27_s10, 4   ;;  %s1702_s29 = sld [smem:[#allocation13_spill]] }
 0x19b   : > { %s1703_s18 = sld [smem:[#allocation12_spill]]  ;;  %s1704_s27 = smov %s1308_s28 }
 0x19c   : > { %s1706_s30 = smov %s1320_s9  ;;  %26 = sbr.rel (!%p24_p9) target bundleno = 10 (0xa), region = 111 }
 0x19f   : > { %s1705_s28 = smov %s1701_s19 }
 0x1a1   : > { %s1707_s9 = smov %s1703_s18 }
 0x1a3   :  { %942 = vsyncpa [#allocation3], 1 }
 0x1a4   :  { %944 = vsyncpa [#allocation3 + $0x1], 1 }
 0x1a5   :  { %945 = vsyncpa [#allocation6], 1 }
 0x1a6   :  { %947 = vsyncpa [#allocation6 + $0x1], 1 }
 0x1a7   :  { %948 = vsyncpa [#allocation4], 1 }
 0x1a8   :  { %950 = vsyncpa [#allocation4 + $0x1], 1 }

</bundles_post_ra>
